<compile_context>
chip_gen: v7x
topology: tpu7x:2x2x1
jax: 0.10.0
libtpu: 0.0.40
codegen_flags: <defaults>
</compile_context>

<pallas_src>
import functools

import jax
import jax.numpy as jnp
from jax.experimental import pallas as pl
from jax.experimental.pallas import tpu as pltpu


def _ntxent_kernel(q_ref, k_ref, o_ref, m_sc, l_sc, pos_sc, *,
                   tile, keys_resident):
    """One (query block i, key block j) grid step of flash-style NT-Xent.

    q_ref : (tq, Dp) pre-normalized queries, 1/T already folded in.
    k_ref : (tk, Dp) pre-normalized keys (streamed), or (B, Dp) (resident).
    Running accumulators (VMEM scratch, shape (1, tq), f32):
      m_sc   : running row max of scaled similarities (LSE stabilization)
      l_sc   : running sum of exp(sim - m)
      pos_sc : positive-pair (diagonal) similarity
    """
    i = pl.program_id(0)
    j = pl.program_id(1)

    @pl.when(j == 0)
    def _():
        m_sc[...] = jnp.full_like(m_sc, -jnp.inf)
        l_sc[...] = jnp.zeros_like(l_sc)
        pos_sc[...] = jnp.zeros_like(pos_sc)

    if keys_resident:
        off = pl.multiple_of(j * tile, tile)
        k = k_ref[pl.ds(off, tile), :]          # slice resident key matrix
    else:
        k = k_ref[...]                          # streamed key block

    # s[a, b] = <key_a, query_b>; queries carry 1/T, so s is the scaled
    # similarity with keys along sublanes and queries along lanes -- all
    # per-query reductions produce lane-dense (1, tq) vectors directly.
    s = jax.lax.dot_general(
        k, q_ref[...],
        dimension_numbers=(((1,), (1,)), ((), ())),
        preferred_element_type=jnp.float32)     # (tk, tq) f32 accumulate

    # Positive pairs live on the diagonal tile; take them from the same f32
    # MXU result that feeds the denominator (consistent precision).
    @pl.when(j == i)
    def _():
        ra = jax.lax.broadcasted_iota(jnp.int32, s.shape, 0)
        cb = jax.lax.broadcasted_iota(jnp.int32, s.shape, 1)
        pos_sc[...] = jnp.sum(jnp.where(ra == cb, s, 0.0),
                              axis=0, keepdims=True)

    # Online log-sum-exp update over key blocks.
    m_prev = m_sc[...]
    m_new = jnp.maximum(m_prev, jnp.max(s, axis=0, keepdims=True))
    alpha = jnp.exp(m_prev - m_new)             # 0 on the first step
    l_sc[...] = alpha * l_sc[...] + jnp.sum(jnp.exp(s - m_new),
                                            axis=0, keepdims=True)
    m_sc[...] = m_new

    @pl.when(j == pl.num_programs(1) - 1)
    def _():
        # per-row loss: log(sum_a exp(d_ba)) - d_bb == m + log(l) - pos
        row = m_sc[...] + jnp.log(l_sc[...]) - pos_sc[...]   # (1, tq)
        o_ref[...] = jnp.broadcast_to(row, o_ref.shape)      # lane-dense store


def _pick_tile(b):
    """Query/key tile: large (up to 512), multiple of 128 when tiling, and
    >= 2 query blocks whenever B allows it (keeps both v7x TCs busy)."""
    if b >= 1024 and b % 512 == 0:
        return 512
    if b >= 512 and b % 256 == 0:
        return 256
    if b >= 256 and b % 128 == 0:
        return 128
    return b   # single tile fallback (small / awkward B)


def _vmem_limit_bytes():
    cap = 128 * 1024 * 1024
    try:
        cap = int(getattr(pltpu.get_tpu_info(), "vmem_capacity_bytes", cap))
    except Exception:
        pass
    return max(32 * 1024 * 1024, min(cap - 16 * 1024 * 1024, 112 * 1024 * 1024))


def ntxent_loss(rep1, rep2, temperature=0.1, *, matmul_dtype=jnp.bfloat16,
                keys_resident=None):
    """Pallas TPU implementation of NTXentLoss.forward(rep1, rep2, temperature)."""
    assert rep1.shape == rep2.shape and rep1.ndim == 2
    B, D = rep1.shape

    inv_temp = jnp.float32(1.0 / temperature)
    eps2 = jnp.float32(1e-24)   # eps on squared norm == torch max(||x||, 1e-12)

    def _l2_normalize(x):
        x = x.astype(jnp.float32)
        n2 = jnp.sum(x * x, axis=1, keepdims=True)
        return x * jax.lax.rsqrt(jnp.maximum(n2, eps2))

    # Pre-normalize once in f32, fold 1/T into the query side, cast once.
    q = (_l2_normalize(rep1) * inv_temp).astype(matmul_dtype)
    k = _l2_normalize(rep2).astype(matmul_dtype)

    # Lane-dense feature dim: zero-pad D to a multiple of 128 (zeros change
    # neither norms nor dot products).
    Dp = max(128, ((D + 127) // 128) * 128)
    if Dp != D:
        pad = ((0, 0), (0, Dp - D))
        q = jnp.pad(q, pad)
        k = jnp.pad(k, pad)

    t = _pick_tile(B)            # tq == tk so the diagonal tile is j == i
    nq = B // t
    nk = B // t

    itemsize = jnp.dtype(matmul_dtype).itemsize
    vmem_limit = _vmem_limit_bytes()

    if keys_resident is None:
        # Keep the full key matrix VMEM-resident only if it (incl. possible
        # double-buffering) comfortably fits next to query tiles + scratch.
        resident_bytes = 2 * B * Dp * itemsize
        working_bytes = 2 * t * Dp * itemsize + 8 * t * t * 4
        keys_resident = (resident_bytes + working_bytes) <= int(0.5 * vmem_limit)

    kernel = functools.partial(_ntxent_kernel, tile=t,
                               keys_resident=keys_resident)

    if keys_resident:
        key_spec = pl.BlockSpec((B, Dp), lambda i, j: (0, 0))  # single DMA
        key_passes = 1
    else:
        key_spec = pl.BlockSpec((t, Dp), lambda i, j: (j, 0))  # streamed
        key_passes = nq

    grid_spec = pltpu.PrefetchScalarGridSpec(
        num_scalar_prefetch=0,
        grid=(nq, nk),
        in_specs=[
            pl.BlockSpec((t, Dp), lambda i, j: (i, 0)),   # query block
            key_spec,                                     # key block / matrix
        ],
        # Lane-dense per-row loss slab: (8, B), block (8, t).
        out_specs=pl.BlockSpec((8, t), lambda i, j: (0, i)),
        scratch_shapes=[pltpu.VMEM((1, t), jnp.float32)] * 3,  # m, l, pos
    )

    cost = pl.CostEstimate(
        flops=2 * B * B * Dp,
        transcendentals=B * B + B * (nk + 1),
        bytes_accessed=(B * Dp + key_passes * B * Dp) * itemsize + 8 * B * 4,
    )

    per_row = pl.pallas_call(
        kernel,
        out_shape=jax.ShapeDtypeStruct((8, B), jnp.float32),
        grid_spec=grid_spec,
        compiler_params=pltpu.CompilerParams(
            dimension_semantics=("parallel", "arbitrary"),
            vmem_limit_bytes=vmem_limit,
        ),
        cost_estimate=cost,
    )(q, k)

    return jnp.sum(per_row[0, :]) / jnp.float32(B)


def _reference_loss(rep1, rep2, temperature=0.1):
    # Pure-JAX f32 reference mirroring the PyTorch module.
    def normalize(v):
        n = jnp.sqrt(jnp.sum(v * v, axis=1, keepdims=True))
        return v / jnp.maximum(n, 1e-12)

    n1 = normalize(rep1.astype(jnp.float32))
    n2 = normalize(rep2.astype(jnp.float32))
    dis = (n1 @ n2.T) / temperature
    pos = jnp.diag(dis)
    denom = jnp.sum(jnp.exp(dis), axis=1)
    return jnp.mean(jnp.log(denom) - pos)


if __name__ == "__main__":
    B, D = 8, 32  # small demo shapes: batch of 8 representations, hidden dim 32
    key = jax.random.PRNGKey(0)
    k1, k2 = jax.random.split(key)
    rep1 = jax.random.normal(k1, (B, D), dtype=jnp.float32)
    rep2 = jax.random.normal(k2, (B, D), dtype=jnp.float32)

    ref = _reference_loss(rep1, rep2, temperature=0.1)

    # Exact-precision path (f32 MXU operands): tight check against reference.
    loss_f32 = jax.block_until_ready(
        ntxent_loss(rep1, rep2, temperature=0.1, matmul_dtype=jnp.float32))
    assert jnp.allclose(loss_f32, ref, atol=1e-4, rtol=1e-4), (loss_f32, ref)

    # Default fast path (bf16 operands, f32 accumulation), resident keys.
    loss_res = jax.block_until_ready(
        ntxent_loss(rep1, rep2, temperature=0.1, keys_resident=True))
    assert jnp.allclose(loss_res, ref, atol=1e-1, rtol=5e-2), (loss_res, ref)

    # Default fast path with streamed key blocks (exercises the other layout).
    loss_str = jax.block_until_ready(
        ntxent_loss(rep1, rep2, temperature=0.1, keys_resident=False))
    assert jnp.allclose(loss_str, ref, atol=1e-1, rtol=5e-2), (loss_str, ref)

    print("KERNEL_OK")
</pallas_src>

<mosaic_0001>
module attributes {stable_mosaic.version = 11 : i64} {
  func.func @_ntxent_kernel(%arg0: i32, %arg1: i32, %arg2: memref<8x128xf32, #tpu.memory_space<vmem>>, %arg3: memref<8x128xf32, #tpu.memory_space<vmem>>, %arg4: memref<8x8xf32, #tpu.memory_space<vmem>>, %arg5: memref<1x8xf32, #tpu.memory_space<vmem>>, %arg6: memref<1x8xf32, #tpu.memory_space<vmem>>, %arg7: memref<1x8xf32, #tpu.memory_space<vmem>>) attributes {dimension_semantics = [#tpu.dimension_semantics<parallel>, #tpu.dimension_semantics<arbitrary>], iteration_bounds = array<i64: 1, 1>, scalar_prefetch = 0 : i64, scratch_operands = 3 : i64, tpu.core_type = #tpu.core_type<tc>, window_params = [{transform_indices = @transform_0, window_bounds = array<i64: 8, 128>}, {pipeline_mode = #tpu.pipeline_mode<synchronous>, transform_indices = @transform_1, window_bounds = array<i64: 8, 128>}, {transform_indices = @transform_2, window_bounds = array<i64: 8, 8>}]} {
    %c0_i32 = arith.constant 0 : i32
    %0 = arith.cmpi eq, %arg1, %c0_i32 : i32
    %1 = arith.extui %0 : i1 to i32
    %c0_i32_0 = arith.constant 0 : i32
    %2 = arith.cmpi ne, %1, %c0_i32_0 : i32
    scf.if %2 {
      %cst_16 = arith.constant 0xFF800000 : f32
      %31 = vector.broadcast %cst_16 : f32 to vector<1x8xf32>
      %c0_17 = arith.constant 0 : index
      %c0_18 = arith.constant 0 : index
      %32 = vector.load %arg5[%c0_17, %c0_18] : memref<1x8xf32, #tpu.memory_space<vmem>>, vector<1x8xf32>
      tpu.vector_store %arg5[%c0_17, %c0_18], %31 {strides = array<i32>} : memref<1x8xf32, #tpu.memory_space<vmem>>, vector<1x8xf32>,
      %cst_19 = arith.constant 0.000000e+00 : f32
      %33 = vector.broadcast %cst_19 : f32 to vector<1x8xf32>
      %c0_20 = arith.constant 0 : index
      %c0_21 = arith.constant 0 : index
      %34 = vector.load %arg6[%c0_20, %c0_21] : memref<1x8xf32, #tpu.memory_space<vmem>>, vector<1x8xf32>
      tpu.vector_store %arg6[%c0_20, %c0_21], %33 {strides = array<i32>} : memref<1x8xf32, #tpu.memory_space<vmem>>, vector<1x8xf32>,
      %cst_22 = arith.constant 0.000000e+00 : f32
      %35 = vector.broadcast %cst_22 : f32 to vector<1x8xf32>
      %c0_23 = arith.constant 0 : index
      %c0_24 = arith.constant 0 : index
      %36 = vector.load %arg7[%c0_23, %c0_24] : memref<1x8xf32, #tpu.memory_space<vmem>>, vector<1x8xf32>
      tpu.vector_store %arg7[%c0_23, %c0_24], %35 {strides = array<i32>} : memref<1x8xf32, #tpu.memory_space<vmem>>, vector<1x8xf32>,
    } else {
    }
    %c8_i32 = arith.constant 8 : i32
    %3 = arith.muli %arg1, %c8_i32 : i32
    %4 = tpu.assume_multiple %3, 8 : i32
    %5 = arith.index_cast %4 : i32 to index
    %c0 = arith.constant 0 : index
    %6 = vector.load %arg3[%5, %c0] : memref<8x128xf32, #tpu.memory_space<vmem>>, vector<8x128xf32>
    %c0_1 = arith.constant 0 : index
    %c0_2 = arith.constant 0 : index
    %7 = vector.load %arg2[%c0_1, %c0_2] : memref<8x128xf32, #tpu.memory_space<vmem>>, vector<8x128xf32>
    %cst = arith.constant dense<0.000000e+00> : vector<8x8xf32>
    %8 = tpu.matmul %6, %7, %cst {dimension_numbers = #tpu.dot_dimension_numbers<[1], [1], [0], [0], [0, 0, 1, 0], [], []>} : vector<8x128xf32>, vector<8x128xf32>, vector<8x8xf32> -> vector<8x8xf32>
    %9 = arith.cmpi eq, %arg1, %arg0 : i32
    %10 = arith.extui %9 : i1 to i32
    %c0_i32_3 = arith.constant 0 : i32
    %11 = arith.cmpi ne, %10, %c0_i32_3 : i32
    scf.if %11 {
      %31 = tpu.iota {dimensions = array<i32: 0>} : vector<8x8xi32>
      %32 = tpu.iota {dimensions = array<i32: 1>} : vector<8x8xi32>
      %33 = arith.cmpi eq, %31, %32 : vector<8x8xi32>
      %cst_16 = arith.constant 0.000000e+00 : f32
      %34 = vector.broadcast %cst_16 : f32 to vector<8x8xf32>
      %35 = arith.select %33, %8, %34 : vector<8x8xi1>, vector<8x8xf32>
      %cst_17 = arith.constant dense<0.000000e+00> : vector<8xf32>
      %36 = vector.multi_reduction <add>, %35, %cst_17 [0] : vector<8x8xf32> to vector<8xf32>
      %37 = vector.shape_cast %36 : vector<8xf32> to vector<1x8xf32>
      %c0_18 = arith.constant 0 : index
      %c0_19 = arith.constant 0 : index
      %38 = vector.load %arg7[%c0_18, %c0_19] : memref<1x8xf32, #tpu.memory_space<vmem>>, vector<1x8xf32>
      tpu.vector_store %arg7[%c0_18, %c0_19], %37 {strides = array<i32>} : memref<1x8xf32, #tpu.memory_space<vmem>>, vector<1x8xf32>,
    } else {
    }
    %c0_4 = arith.constant 0 : index
    %c0_5 = arith.constant 0 : index
    %12 = vector.load %arg5[%c0_4, %c0_5] : memref<1x8xf32, #tpu.memory_space<vmem>>, vector<1x8xf32>
    %cst_6 = arith.constant dense<0xFF800000> : vector<8xf32>
    %13 = vector.multi_reduction <maximumf>, %8, %cst_6 [0] : vector<8x8xf32> to vector<8xf32>
    %14 = vector.shape_cast %13 : vector<8xf32> to vector<1x8xf32>
    %15 = arith.maximumf %12, %14 : vector<1x8xf32>
    %16 = arith.subf %12, %15 : vector<1x8xf32>
    %17 = math.exp %16 : vector<1x8xf32>
    %c0_7 = arith.constant 0 : index
    %c0_8 = arith.constant 0 : index
    %18 = vector.load %arg6[%c0_7, %c0_8] : memref<1x8xf32, #tpu.memory_space<vmem>>, vector<1x8xf32>
    %19 = arith.mulf %17, %18 : vector<1x8xf32>
    %20 = vector.broadcast %15 : vector<1x8xf32> to vector<8x8xf32>
    %21 = arith.subf %8, %20 : vector<8x8xf32>
    %22 = math.exp %21 : vector<8x8xf32>
    %cst_9 = arith.constant dense<0.000000e+00> : vector<8xf32>
    %23 = vector.multi_reduction <add>, %22, %cst_9 [0] : vector<8x8xf32> to vector<8xf32>
    %24 = vector.shape_cast %23 : vector<8xf32> to vector<1x8xf32>
    %25 = arith.addf %19, %24 : vector<1x8xf32>
    %c0_10 = arith.constant 0 : index
    %c0_11 = arith.constant 0 : index
    %26 = vector.load %arg6[%c0_10, %c0_11] : memref<1x8xf32, #tpu.memory_space<vmem>>, vector<1x8xf32>
    tpu.vector_store %arg6[%c0_10, %c0_11], %25 {strides = array<i32>} : memref<1x8xf32, #tpu.memory_space<vmem>>, vector<1x8xf32>,
    %c0_12 = arith.constant 0 : index
    %c0_13 = arith.constant 0 : index
    %27 = vector.load %arg5[%c0_12, %c0_13] : memref<1x8xf32, #tpu.memory_space<vmem>>, vector<1x8xf32>
    tpu.vector_store %arg5[%c0_12, %c0_13], %15 {strides = array<i32>} : memref<1x8xf32, #tpu.memory_space<vmem>>, vector<1x8xf32>,
    %c0_i32_14 = arith.constant 0 : i32
    %28 = arith.cmpi eq, %arg1, %c0_i32_14 : i32
    %29 = arith.extui %28 : i1 to i32
    %c0_i32_15 = arith.constant 0 : i32
    %30 = arith.cmpi ne, %29, %c0_i32_15 : i32
    scf.if %30 {
      %c0_16 = arith.constant 0 : index
      %c0_17 = arith.constant 0 : index
      %31 = vector.load %arg5[%c0_16, %c0_17] : memref<1x8xf32, #tpu.memory_space<vmem>>, vector<1x8xf32>
      %c0_18 = arith.constant 0 : index
      %c0_19 = arith.constant 0 : index
      %32 = vector.load %arg6[%c0_18, %c0_19] : memref<1x8xf32, #tpu.memory_space<vmem>>, vector<1x8xf32>
      %33 = math.log %32 : vector<1x8xf32>
      %34 = arith.addf %31, %33 : vector<1x8xf32>
      %c0_20 = arith.constant 0 : index
      %c0_21 = arith.constant 0 : index
      %35 = vector.load %arg7[%c0_20, %c0_21] : memref<1x8xf32, #tpu.memory_space<vmem>>, vector<1x8xf32>
      %36 = arith.subf %34, %35 : vector<1x8xf32>
      %37 = vector.shape_cast %36 : vector<1x8xf32> to vector<1x8xf32>
      %38 = vector.broadcast %37 : vector<1x8xf32> to vector<8x8xf32>
      %c0_22 = arith.constant 0 : index
      %c0_23 = arith.constant 0 : index
      %39 = vector.load %arg4[%c0_22, %c0_23] : memref<8x8xf32, #tpu.memory_space<vmem>>, vector<8x8xf32>
      tpu.vector_store %arg4[%c0_22, %c0_23], %38 {strides = array<i32>} : memref<8x8xf32, #tpu.memory_space<vmem>>, vector<8x8xf32>,
    } else {
    }
    return
  }
  func.func @transform_0(%arg0: i32, %arg1: i32) -> (i32, i32) {
    %c0_i32 = arith.constant 0 : i32
    %c0_i32_0 = arith.constant 0 : i32
    return %arg0, %c0_i32 : i32, i32
  }
  func.func @transform_1(%arg0: i32, %arg1: i32) -> (i32, i32) {
    %c0_i32 = arith.constant 0 : i32
    %c0_i32_0 = arith.constant 0 : i32
    %c0_i32_1 = arith.constant 0 : i32
    return %c0_i32, %c0_i32_0 : i32, i32
  }
  func.func @transform_2(%arg0: i32, %arg1: i32) -> (i32, i32) {
    %c0_i32 = arith.constant 0 : i32
    %c0_i32_0 = arith.constant 0 : i32
    return %c0_i32, %arg0 : i32, i32
  }
}

</mosaic_0001>

<bundles_post_ra>
// kernel: tpu_custom_call.1
= control target key start
LH: loop header
LB: loop body
LE: loop exit
PB: predicated region body
PF: predicated region fallthrough
CT: control target
= control target key end

     0   :  { %7 = vsyncpa [#allocation6], 0  ;;  %s364_s0 = inlined_call_operand.hbm [shape: f32[8,128], index: 0, kind: input, shape index: {}]   ;;  %s365_s1 = inlined_call_operand.hbm [shape: f32[8,128], index: 1, kind: input, shape index: {}]   ;;  %s366_s2 = inlined_call_operand.hbm [shape: f32[8,8], index: 2, kind: output, shape index: {}]  }
   0x1   :  { %8 = vsyncpa [#allocation9], 0 }
   0x2   :  { %9 = vsyncpa [#allocation7], 0  ;;  %s297_s9 = smov [#allocation5]   ;;  %s298_s11 = smov [#allocation8]  }
   0x3   :  { %s16_s10 = sshll.u32 %s297_s9, 4  ;;  %s26_s12 = sshll.u32 %s298_s11, 4  ;;  %s17_s10 = int_to_ptr.vmem [resolvable:$true] %s16_s10  ;;  %s27_s12 = int_to_ptr.vmem [resolvable:$true] %s26_s12 }
   0x4   :  { %s225_s15 = scalar_lea.hbm %s364_s0, 128 }
   0x5   :  { %p226_p0 = scmp.ne.s32.totalorder %s364_s0, %s225_s15  ;;  %p229_p1 = scmp.lt.u32.totalorder %s225_s15, %s364_s0 }
   0x7   :  { %p231_p2 = pnand %p229_p1, %p226_p0 }
   0x9   :  { %234 = shalt.err (!%p231_p2)
}
   0xa   :  { %s235_s20 = scalar_lea.vmem %s17_s10, 128  ;;  %p240_p4 = scmp.lt.s32.totalorder %s17_s10, %s17_s10 }
   0xb   :  { %p236_p3 = scmp.ne.s32.totalorder %s17_s10, %s235_s20  ;;  %p241_p5 = scmp.lt.s32.totalorder %s235_s20, %s235_s20 }
   0xd   :  { %p242_p6 = por %p241_p5, %p240_p4 }
   0xf   :  { %p243_p7 = pnand %p242_p6, %p236_p3 }
  0x11   :  { %246 = shalt.err (!%p243_p7)
}
  0x12   :  { %19 = dma.hbm_to_vmem [thread:$0]  %s364_s0, 128, %s17_s10, [#allocation6]  }
  0x13   :  { %s247_s25 = scalar_lea.hbm %s365_s1, 128 }
  0x14   :  { %p248_p8 = scmp.ne.s32.totalorder %s365_s1, %s247_s25  ;;  %p251_p9 = scmp.lt.u32.totalorder %s247_s25, %s365_s1 }
  0x16   :  { %p253_p10 = pnand %p251_p9, %p248_p8 }
  0x18   :  { %256 = shalt.err (!%p253_p10)
}
  0x19   :  { %s257_s30 = scalar_lea.vmem %s27_s12, 128  ;;  %p262_p12 = scmp.lt.s32.totalorder %s27_s12, %s27_s12 }
  0x1a   :  { %p258_p11 = scmp.ne.s32.totalorder %s27_s12, %s257_s30  ;;  %p263_p13 = scmp.lt.s32.totalorder %s257_s30, %s257_s30 }
  0x1c   :  { %p264_p0 = por %p263_p13, %p262_p12 }
  0x1e   :  { %p265_p1 = pnand %p264_p0, %p258_p11 }
  0x20   :  { %268 = shalt.err (!%p265_p1)
}
  0x21   :  { %29 = dma.hbm_to_vmem [thread:$0]  %s365_s1, 128, %s27_s12, [#allocation9]  }
  0x22   :  { %291 = dma.done.wait [#allocation6], 128  }
  0x23   :  { %292 = vsyncadd [#allocation6], 4294967168 }
  0x24   :  { %293 = dma.done.wait [#allocation9], 128  }
  0x25   :  { %294 = vsyncadd [#allocation9], 4294967168  ;;  %vm40_vm0 = vcmask 57344   ;;  %v299_v0 = vmov 0.0   ;;  %vm300_vm1 = vmmov 0   ;;  %v301_v1 = vmov -inf  }
  0x26   :  { %42 = vst.msk [vmem:[#allocation3] sm:$0x1] %vm40_vm0, %v299_v0  ;;  %43 = vst.msk [vmem:[#allocation4] sm:$0x1] %vm40_vm0, %v299_v0  ;;  %208 = vmatprep.subr.mxu0 %v299_v0  ;;  %210 = vmatprep.mubr.msk.f32.mxu0 %vm300_vm1, %v299_v0  ;;  %v47_v2 = vld [vmem:[#allocation5] sm:$0xff]  ;;  %v46_v3 = vld [vmem:[#allocation8] sm:$0xff]  ;;  %v122_v4 = vlaneseq }
  0x27   :  { %41 = vst.msk [vmem:[#allocation2] sm:$0x1] %vm40_vm0, %v301_v1  ;;  %209 = vmatpush3.xpose.msra.mxu0 %v47_v2  ;;  %vm128_vm3 = vcmask 64512   ;;  %s302_s1 = smov [#allocation10]  }
  0x28   :  { %v123_v5 = vshrl.u32 %v122_v4, 7  ;;  %v125_v6 = vand.u32 127, %v122_v4  ;;  %s196_s4 = sshll.u32 %s302_s1, 4  ;;  %s197_s4 = int_to_ptr.vmem [resolvable:$true] %s196_s4 }
  0x29   :  { %s269_s5 = scalar_lea.vmem %s197_s4, 128  ;;  %p274_p3 = scmp.lt.s32.totalorder %s197_s4, %s197_s4 }
  0x2a   :  { %211 = vmatmul.mubr.f32.vlgmr.msra.gmra.mrb[0].mxu0 %v46_v3  ;;  %vm126_vm2 = vcmp.eq.s32.totalorder %v123_v5, %v125_v6  ;;  %v156_v24 = vsub.s32 0, %v123_v5  ;;  %p270_p2 = scmp.ne.s32.totalorder %s197_s4, %s269_s5  ;;  %p275_p4 = scmp.lt.s32.totalorder %s269_s5, %s269_s5 }
  0x2c   :  { %p276_p5 = por %p275_p4, %p274_p3 }
  0x2d   :  { %v151_v39 = vld [vmem:[#allocation3] sm:$0x1] }
  0x2e   :  { %v138_v22 = vld [vmem:[#allocation2] sm:$0x1]  ;;  %p277_p6 = pnand %p276_p5, %p270_p2 }
  0xfd   :  { %v114_v7 = vpop.f32.mrb[0].mxu0 }
  0xfe   :  { %v127_v8 = vsel %vm126_vm2, %v114_v7, 0.0  ;;  %v140_v9 = vsel %vm128_vm3, %v114_v7, -inf  ;;  %v212_v10 = vpop.f32.mrb[1].mxu0 }
  0xff   :  { %v129_v11 = vsel %vm128_vm3, %v127_v8, 0.0  ;;  %v141_v12 = vrot.slane %v140_v9, 4 }
 0x100   :  { %v130_v13 = vrot.slane %v129_v11, 4 }
 0x101   :  { %v142_v14 = vmax.f32 %v140_v9, %v141_v12 }
 0x102   :  { %v131_v15 = vadd.f32 %v130_v13, %v129_v11 }
 0x103   :  { %v143_v16 = vrot.slane %v142_v14, 2 }
 0x104   :  { %v132_v17 = vrot.slane %v131_v15, 2 }
 0x105   :  { %v144_v18 = vmax.f32 %v142_v14, %v143_v16 }
 0x106   :  { %v133_v19 = vadd.f32 %v132_v17, %v131_v15 }
 0x107   :  { %v145_v20 = vrot.slane %v144_v18, 1 }
 0x108   :  { %v134_v21 = vrot.slane %v133_v19, 1 }
 0x109   :  { %v146_v23 = vmax.f32 %v144_v18, %v145_v20 }
 0x10a   :  { %v135_v25 = vadd.f32 %v134_v21, %v133_v19 }
 0x10b   :  { %v147_v26 = vmax.f32 %v138_v22, %v146_v23 }
 0x10c   :  { %137 = vst.msk [vmem:[#allocation4] sm:$0x1] %vm40_vm0, %v135_v25 }
 0x10d   :  { %v157_v27 = vrot.slane %v147_v26, %v156_v24  ;;  %172 = vst.msk [vmem:[#allocation2] sm:$0x1] %vm40_vm0, %v147_v26  ;;  %v148_v30 = vsub.f32 %v138_v22, %v147_v26 }
 0x10f   :  { %v159_v28 = vsub.f32 %v114_v7, %v157_v27  ;;  %v149_v31 = vmul.f32 1.442695, %v148_v30 }
 0x111   :  { %v160_v29 = vmul.f32 1.442695, %v159_v28 }
 0x113   :  { %219 = vpow2.f32 %v160_v29  ;;  %v181_v49 = vld [vmem:[#allocation4] sm:$0x1] }
 0x114   :  { %221 = vpow2.f32 %v149_v31  ;;  %v176_v47 = vld [vmem:[#allocation2] sm:$0x1] }
 0x11d   :  { %v220_v32 = vpop.eup %219 }
 0x11e   :  { %v162_v33 = vsel %vm128_vm3, %v220_v32, 0.0  ;;  %v222_v38 = vpop.eup %221 }
 0x11f   :  { %v163_v34 = vrot.slane %v162_v33, 4  ;;  %v152_v41 = vmul.f32 %v222_v38, %v151_v39 }
 0x121   :  { %v164_v35 = vadd.f32 %v163_v34, %v162_v33 }
 0x123   :  { %v165_v36 = vrot.slane %v164_v35, 2 }
 0x125   :  { %v166_v37 = vadd.f32 %v165_v36, %v164_v35 }
 0x127   :  { %v167_v40 = vrot.slane %v166_v37, 1 }
 0x129   :  { %v168_v42 = vadd.f32 %v167_v40, %v166_v37 }
 0x12b   :  { %v169_v43 = vadd.f32 %v168_v42, %v152_v41 }
 0x12d   :  { %171 = vst.msk [vmem:[#allocation3] sm:$0x1] %vm40_vm0, %v169_v43 }
 0x134   :  { %v177_v44 = vld [vmem:[#allocation3] sm:$0x1] }
 0x135   :  { %223 = vlog2.f32 %v177_v44 }
 0x13f   :  { %v224_v45 = vpop.eup %223 }
 0x140   :  { %v179_v46 = vmul.f32 0.6931472, %v224_v45 }
 0x142   :  { %v180_v48 = vadd.f32 %v179_v46, %v176_v47 }
 0x144   :  { %v182_v50 = vsub.f32 %v180_v48, %v181_v49 }
 0x146   :  { %v187_v51 = vrot.slane %v182_v50, %v156_v24 }
 0x148   :  { %189 = vst.msk [vmem:[#allocation10] sm:$0xff] %vm128_vm3, %v187_v51 }
 0x149   :  { %280 = shalt.err (!%p277_p6)
}
 0x14a   :  { %s281_s8 = scalar_lea.hbm %s366_s2, 128 }
 0x14b   :  { %p282_p7 = scmp.ne.s32.totalorder %s366_s2, %s281_s8  ;;  %p285_p8 = scmp.lt.u32.totalorder %s281_s8, %s366_s2 }
 0x14d   :  { %p287_p9 = pnand %p285_p8, %p282_p7 }
 0x14f   :  { %290 = shalt.err (!%p287_p9)
}
 0x150   :  { %199 = dma.vmem_to_hbm [thread:$0]  %s197_s4, 128, %s366_s2, [#allocation7]  }
 0x151   :  { %295 = dma.done.wait [#allocation7], 128  }
 0x152   :  { %296 = vsyncadd [#allocation7], 4294967168 }
 0x153   :  { %203 = vsyncpa [#allocation6], 1 }
 0x154   :  { %204 = vsyncpa [#allocation9], 1 }
 0x155   :  { %205 = vsyncpa [#allocation7], 1 }

</bundles_post_ra>
